<compile_context>
chip_gen: v7x
topology: tpu7x:2x2x1
jax: 0.10.0
libtpu: 0.0.40
codegen_flags: <defaults>
</compile_context>

<pallas_src>
import jax
import jax.numpy as jnp
import numpy as np
from jax import lax
from jax.experimental import pallas as pl
from jax.experimental.pallas import tpu as pltpu

EPS = 1e-12


def _round_up(n, m):
    return ((n + m - 1) // m) * m


def _softplus(x):
    return jnp.maximum(x, 0.0) + jnp.log1p(jnp.exp(-jnp.abs(x)))


def _softmax_lastdim(x):
    # approx reciprocal (~1e-3-level rel error) is a deliberate speed/accuracy trade:
    # EUP vrcp instead of a VALU divide.  Documented per review; swap approx=False if
    # this ever feeds training-accuracy-critical paths.
    m = jnp.max(x, axis=-1, keepdims=True)
    e = jnp.exp(x - m)
    return e * pl.reciprocal(jnp.sum(e, axis=-1, keepdims=True), approx=True)


# --------------------------------------------------------------------------------------
# Kernel A: per-batch-tile NTM forward (hidden -> mu/log_sigma -> kld, sampled rec loss).
# --------------------------------------------------------------------------------------
def make_ntm_kernel(n_topics, exp_dtype):
    K = n_topics

    def kernel(x_ref, eps_ref, w1_ref, b1_ref, wmu_ref, bmu_ref, wls_ref, bls_ref,
               wtb_ref, out_ref):
        wdt = w1_ref.dtype
        xc = x_ref[...]                                       # (TB, V), param dtype
        TB = xc.shape[0]
        S = eps_ref.shape[0]

        # ---- encoder: Linear + Softplus, then mu / log_sigma (two small matmuls) ----
        h = _softplus(jnp.dot(xc, w1_ref[...],
                              preferred_element_type=jnp.float32) + b1_ref[...])   # (TB,H) f32
        hc = h.astype(wdt)
        mu = jnp.dot(hc, wmu_ref[...],
                     preferred_element_type=jnp.float32) + bmu_ref[...]            # (TB,K)
        log_sigma = jnp.dot(hc, wls_ref[...],
                            preferred_element_type=jnp.float32) + bls_ref[...]     # (TB,K)

        # KL(q(z|x) || N(0, I))
        kld = -0.5 * jnp.sum(1.0 - mu * mu + 2.0 * log_sigma
                             - jnp.exp(2.0 * log_sigma),
                             axis=-1, keepdims=True)                               # (TB,1)

        # ---- x-side contractions, all on the MXU:  x @ [wt_kv; bt; 1]^T -------------
        wtb = wtb_ref[...]                                                         # (K+2,V)
        xw_all = lax.dot_general(xc, wtb, (((1,), (1,)), ((), ())),
                                 preferred_element_type=jnp.float32)               # (TB,K+2)
        xw = xw_all[:, :K]                  # x · wt_kv[k, :]          (TB, K)
        xbt = xw_all[:, K:K + 1]            # x · bt                   (TB, 1)
        sum_x = xw_all[:, K + 1:K + 2]      # sum_v x                  (TB, 1)

        # ---- all n_sample reparameterized samples through ONE big matmul ------------
        sigma = jnp.exp(log_sigma)                                                 # (TB,K)
        z = _softmax_lastdim(eps_ref[...] * sigma[None] + mu[None])                # (S,TB,K)
        z2 = z.reshape(S * TB, K)
        logits = jnp.dot(z2.astype(wdt), wtb[:K, :],
                         preferred_element_type=jnp.float32) + wtb[K:K + 1, :]     # (S*TB,V)

        # log-sum-exp over the vocab (exp in bf16 on the bf16 path: EUP bf16 rate on
        # v6e/v7x, auto-upcast and merely neutral on v5e).
        m = jnp.max(logits, axis=-1, keepdims=True)
        e = jnp.exp((logits - m).astype(exp_dtype))
        lse = m + jnp.log(jnp.sum(e.astype(jnp.float32), axis=-1, keepdims=True))  # (S*TB,1)

        # rec = (1/S) * sum_s [ lse_s*sum(x) - z_s·(x@wt^T) - x·bt ]
        lse_sum = jnp.sum(lse.reshape(S, TB, 1), axis=0)                           # (TB,1)
        zbar = jnp.sum(z, axis=0)                                                  # (TB,K)
        zxw = jnp.sum(zbar * xw, axis=-1, keepdims=True)                           # (TB,1)
        rec = (lse_sum * sum_x - zxw) * (1.0 / S) - xbt                            # (TB,1)

        # lane-dense store: row 0 = rec, row 1 = kld
        out_ref[...] = jnp.concatenate([rec, kld], axis=1).T                       # (2,TB)

    return kernel


# --------------------------------------------------------------------------------------
# Kernel B: batch-independent topic/embedding coherence penalty (runs exactly once).
#   pen = -coef * sum_k ||t_k||^2 / ((||t_k||+eps)(||w_k||+eps)),  t^T = wt_kv @ nv,
# algebraically identical to  -coef * sum(nv @ nt * nw)  of the reference.
# Tiled over V so a large vocab never has to fit VMEM whole.
# --------------------------------------------------------------------------------------
def make_penalty_kernel(penalty_coef, v_total, tv):
    def kernel(wt_ref, emb_ref, pen_ref, t_acc, wsq_acc):
        vb = pl.program_id(0)

        @pl.when(vb == 0)
        def _init():
            t_acc[...] = jnp.zeros_like(t_acc)
            wsq_acc[...] = jnp.zeros_like(wsq_acc)

        wt = wt_ref[...]                                       # (K, TV) f32
        emb = emb_ref[...]                                     # (TV, E) f32
        if v_total % tv != 0:                                  # mask the ragged last block
            v0 = vb * tv
            wcol = lax.broadcasted_iota(jnp.int32, wt.shape, 1) + v0
            wt = jnp.where(wcol < v_total, wt, 0.0)
            erow = lax.broadcasted_iota(jnp.int32, emb.shape, 0) + v0
            emb = jnp.where(erow < v_total, emb, 0.0)

        # row-normalize the embedding block exactly like the reference: e / (||e|| + eps)
        nv = emb / (jnp.sqrt(jnp.sum(emb * emb, axis=1, keepdims=True)) + EPS)     # (TV,E)

        t_acc[...] += jnp.dot(wt, nv, preferred_element_type=jnp.float32)          # (K, E)
        wsq_acc[...] += jnp.sum(wt * wt, axis=1, keepdims=True)                    # (K, 1)

        @pl.when(vb == pl.num_programs(0) - 1)
        def _finalize():
            tT = t_acc[...]
            t_sq = jnp.sum(tT * tT, axis=1, keepdims=True)                         # (K,1)
            per_k = t_sq / ((jnp.sqrt(t_sq) + EPS) * (jnp.sqrt(wsq_acc[...]) + EPS))
            pen_ref[...] = -penalty_coef * jnp.sum(per_k, axis=0, keepdims=True)   # (1,1)

    return kernel


# --------------------------------------------------------------------------------------
# Wrapper
# --------------------------------------------------------------------------------------
def ntmr_forward(x, params, eps, penalty_coef, *,
                 batch_block=256, vocab_block=2048, param_dtype=jnp.bfloat16):
    B, V = x.shape
    S, _, K = eps.shape
    H = params['w1_t'].shape[1]
    E = params['emb'].shape[1]
    f32 = jnp.float32
    dt = jnp.dtype(param_dtype)

    # --- weights for the batch-tiled NTM kernel (bf16 by default: native MXU rate on
    # --- v6e/v7x, half the weight DMA/VMEM; all softmax/KL/LSE math stays f32) -------
    w1 = params['w1_t'].astype(dt)                                     # (V, H)
    wmu = params['wmu_t'].astype(dt)                                   # (H, K)
    wls = params['wls_t'].astype(dt)                                   # (H, K)
    b1 = params['b1'].astype(f32)
    bmu = params['bmu'].astype(f32)
    bls = params['bls'].astype(f32)
    # topic weight with the decoder bias and a row of ones appended so that x@wt_kv^T,
    # x·bt and sum_v(x) all ride one MXU contraction (and bt folds into the logits).
    wtb = jnp.concatenate([params['wt_kv'].astype(f32),
                           params['bt'].astype(f32),
                           jnp.ones((1, V), f32)], axis=0).astype(dt)  # (K+2, V)
    # x only ever feeds MXU contractions now -> cast once in HBM (halves x DMA on bf16).
    x_in = x.astype(dt)

    # --- batch tile: multiple of 128 (lane-dense (2, tb) output blocks); >= 2 grid
    # --- steps when B allows so v7x's second TensorCore gets work; the ragged last
    # --- tile is masked by Pallas (no padded HBM copy of x / eps).
    if B <= 128:
        tb = B
    else:
        tb = min(_round_up(batch_block, 128), max(128, _round_up(B // 2, 128)))
    grid_b = pl.cdiv(B, tb)

    # --- explicit scoped-VMEM budget (default is only 16 MiB v5e / 32 MiB v6e,v7x) ---
    wbytes = dt.itemsize
    est = (2 * (tb * V * wbytes + S * tb * K * 4 + 2 * tb * 4)                    # streamed blocks
           + 2 * ((V * H + 2 * H * K + (K + 2) * V) * wbytes + (H + 2 * K) * 4)   # resident weights
           + 2 * S * tb * V * 4                                                   # logits + exp
           + 2 * tb * H * 4 + 4 * S * tb * K * 4)                                 # h, z, mu, ...
    try:
        vmem_cap = pltpu.get_tpu_info().vmem_capacity_bytes
    except Exception:
        vmem_cap = 64 * 1024 * 1024                     # conservative (v7x-sized) fallback
    vmem_limit = int(min(int(0.9 * vmem_cap), max(32 * 1024 * 1024, 2 * est)))

    const2 = lambda i: (0, 0)
    exp_dtype = jnp.bfloat16 if dt == jnp.dtype(jnp.bfloat16) else jnp.float32

    reckld = pl.pallas_call(
        make_ntm_kernel(K, exp_dtype),
        out_shape=jax.ShapeDtypeStruct((2, B), jnp.float32),
        grid=(grid_b,),
        in_specs=[
            pl.BlockSpec((tb, V), lambda i: (i, 0)),            # x     (streamed over B)
            pl.BlockSpec((S, tb, K), lambda i: (0, i, 0)),      # eps   (streamed over B)
            pl.BlockSpec((V, H), const2),                       # w1    (resident)
            pl.BlockSpec((1, H), const2),                       # b1
            pl.BlockSpec((H, K), const2),                       # wmu
            pl.BlockSpec((1, K), const2),                       # bmu
            pl.BlockSpec((H, K), const2),                       # wls
            pl.BlockSpec((1, K), const2),                       # bls
            pl.BlockSpec((K + 2, V), const2),                   # [wt_kv; bt; ones]
        ],
        out_specs=pl.BlockSpec((2, tb), lambda i: (0, i)),      # lane-dense rec/kld slab
        compiler_params=pltpu.CompilerParams(
            dimension_semantics=("parallel",),
            vmem_limit_bytes=vmem_limit),
    )(x_in, eps, w1, b1, wmu, bmu, wls, bls, wtb)

    # --- coherence penalty: runs once, always f32 (f32 weights for free precision) ---
    wt32 = params['wt_kv'].astype(f32)                                   # (K, V)
    emb32 = params['emb'].astype(f32)                                    # (V, E)
    tv = V if V <= vocab_block else _round_up(vocab_block, 128)
    pen = pl.pallas_call(
        make_penalty_kernel(penalty_coef, V, tv),
        out_shape=jax.ShapeDtypeStruct((1, 1), jnp.float32),
        grid=(pl.cdiv(V, tv),),
        in_specs=[pl.BlockSpec((K, tv), lambda v: (0, v)),
                  pl.BlockSpec((tv, E), lambda v: (v, 0))],
        out_specs=pl.BlockSpec((1, 1), lambda v: (0, 0)),
        scratch_shapes=[pltpu.VMEM((K, E), f32),
                        pltpu.VMEM((K, 1), f32)],
        compiler_params=pltpu.CompilerParams(
            dimension_semantics=("arbitrary",)),
    )(wt32, emb32)

    rec = reckld[0]
    kld = reckld[1]
    pen_s = pen[0, 0]
    minus_elbo = rec + kld
    return {'loss': minus_elbo + pen_s, 'minus_elbo': minus_elbo,
            'rec_loss': rec, 'kld': kld, 'penalty': pen_s}


# --------------------------------------------------------------------------------------
# Pure-JAX reference mirroring the PyTorch forward exactly.
# --------------------------------------------------------------------------------------
def ntmr_reference(x, p, eps, penalty_coef):
    h = jax.nn.softplus(x @ p['w1_t'] + p['b1'])
    mu = h @ p['wmu_t'] + p['bmu']
    log_sigma = h @ p['wls_t'] + p['bls']
    kld = -0.5 * jnp.sum(1.0 - mu ** 2 + 2.0 * log_sigma - jnp.exp(2.0 * log_sigma), axis=-1)
    rec = 0.0
    for i in range(eps.shape[0]):
        z = eps[i] * jnp.exp(log_sigma) + mu
        z = jax.nn.softmax(z, axis=-1)
        log_prob = jax.nn.log_softmax(z @ p['wt_kv'] + p['bt'], axis=-1)
        rec = rec - jnp.sum(log_prob * x, axis=-1)
    rec = rec / eps.shape[0]
    emb, w = p['emb'], p['wt_vk']
    nv = emb / (jnp.linalg.norm(emb, axis=1, keepdims=True) + EPS)
    nw = w / (jnp.linalg.norm(w, axis=0, keepdims=True) + EPS)
    t = nv.T @ w
    nt = t / (jnp.linalg.norm(t, axis=0, keepdims=True) + EPS)
    s = nv @ nt
    pen = -(s * nw).sum() * penalty_coef
    minus_elbo = rec + kld
    return {'loss': minus_elbo + pen, 'minus_elbo': minus_elbo, 'rec_loss': rec,
            'kld': kld, 'penalty': pen}


if __name__ == "__main__":
    B, V, H, K, E = 8, 256, 64, 32, 64          # batch, vocab, hidden, topics, embed dim
    penalty_coef = 0.5
    n_sample = 2

    key = jax.random.PRNGKey(0)
    ks = jax.random.split(key, 11)
    x = jax.random.uniform(ks[0], (B, V), jnp.float32)          # bag-of-words-like input

    params = {
        'w1_t':  0.10 * jax.random.normal(ks[1], (V, H), jnp.float32),   # hidden Linear (in,out)
        'b1':    0.10 * jax.random.normal(ks[2], (1, H), jnp.float32),
        'wmu_t': 0.10 * jax.random.normal(ks[3], (H, K), jnp.float32),
        'bmu':   0.10 * jax.random.normal(ks[4], (1, K), jnp.float32),
        'wls_t': 0.05 * jax.random.normal(ks[5], (H, K), jnp.float32),
        'bls':   0.05 * jax.random.normal(ks[6], (1, K), jnp.float32),
        'wt_vk': 0.10 * jax.random.normal(ks[7], (V, K), jnp.float32),   # topics.weight (out=V,in=K)
        'bt':    0.10 * jax.random.normal(ks[8], (1, V), jnp.float32),
        'emb':   0.10 * jax.random.normal(ks[9], (V, E), jnp.float32),   # embedding.weight
    }
    params['wt_kv'] = jnp.asarray(params['wt_vk'].T)                     # (K, V) for z @ W^T

    # Gaussian noise replacing torch.zeros_like(mu).normal_() for each sample.
    eps = jax.random.normal(ks[10], (n_sample, B, K), jnp.float32)

    ref = ntmr_reference(x, params, eps, penalty_coef)

    # exact path (f32 weights & activations)
    out_f32 = ntmr_forward(x, params, eps, penalty_coef, param_dtype=jnp.float32)
    out_f32 = jax.tree_util.tree_map(jax.block_until_ready, out_f32)
    for name in ('loss', 'minus_elbo', 'rec_loss', 'kld', 'penalty'):
        np.testing.assert_allclose(np.asarray(out_f32[name]), np.asarray(ref[name]),
                                   rtol=2e-3, atol=2e-3)

    # default path (bf16 weights / x, f32 accumulation) — looser tolerance vs f32 ref
    out = ntmr_forward(x, params, eps, penalty_coef)
    out = jax.tree_util.tree_map(jax.block_until_ready, out)
    for name in ('loss', 'minus_elbo', 'rec_loss', 'kld', 'penalty'):
        np.testing.assert_allclose(np.asarray(out[name]), np.asarray(ref[name]),
                                   rtol=5e-2, atol=5e-2)

    print("KERNEL_OK")
</pallas_src>

<mosaic_0001>
module attributes {stable_mosaic.version = 11 : i64} {
  func.func @kernel(%arg0: i32, %arg1: memref<8x256xf32, #tpu.memory_space<vmem>>, %arg2: memref<2x8x32xf32, #tpu.memory_space<vmem>>, %arg3: memref<256x64xf32, #tpu.memory_space<vmem>>, %arg4: memref<1x64xf32, #tpu.memory_space<vmem>>, %arg5: memref<64x32xf32, #tpu.memory_space<vmem>>, %arg6: memref<1x32xf32, #tpu.memory_space<vmem>>, %arg7: memref<64x32xf32, #tpu.memory_space<vmem>>, %arg8: memref<1x32xf32, #tpu.memory_space<vmem>>, %arg9: memref<34x256xf32, #tpu.memory_space<vmem>>, %arg10: memref<2x8xf32, #tpu.memory_space<vmem>>) attributes {dimension_semantics = [#tpu.dimension_semantics<parallel>], iteration_bounds = array<i64: 1>, scalar_prefetch = 0 : i64, scratch_operands = 0 : i64, tpu.core_type = #tpu.core_type<tc>, window_params = [{transform_indices = @transform_0, window_bounds = array<i64: 8, 256>}, {transform_indices = @transform_1, window_bounds = array<i64: 2, 8, 32>}, {pipeline_mode = #tpu.pipeline_mode<synchronous>, transform_indices = @transform_2, window_bounds = array<i64: 256, 64>}, {pipeline_mode = #tpu.pipeline_mode<synchronous>, transform_indices = @transform_3, window_bounds = array<i64: 1, 64>}, {pipeline_mode = #tpu.pipeline_mode<synchronous>, transform_indices = @transform_4, window_bounds = array<i64: 64, 32>}, {pipeline_mode = #tpu.pipeline_mode<synchronous>, transform_indices = @transform_5, window_bounds = array<i64: 1, 32>}, {pipeline_mode = #tpu.pipeline_mode<synchronous>, transform_indices = @transform_6, window_bounds = array<i64: 64, 32>}, {pipeline_mode = #tpu.pipeline_mode<synchronous>, transform_indices = @transform_7, window_bounds = array<i64: 1, 32>}, {pipeline_mode = #tpu.pipeline_mode<synchronous>, transform_indices = @transform_8, window_bounds = array<i64: 34, 256>}, {transform_indices = @transform_9, window_bounds = array<i64: 2, 8>}]} {
    %c0 = arith.constant 0 : index
    %c0_0 = arith.constant 0 : index
    %0 = vector.load %arg1[%c0, %c0_0] : memref<8x256xf32, #tpu.memory_space<vmem>>, vector<8x256xf32>
    %c0_1 = arith.constant 0 : index
    %c0_2 = arith.constant 0 : index
    %1 = vector.load %arg3[%c0_1, %c0_2] : memref<256x64xf32, #tpu.memory_space<vmem>>, vector<256x64xf32>
    %cst = arith.constant dense<0.000000e+00> : vector<8x64xf32>
    %2 = tpu.matmul %0, %1, %cst {dimension_numbers = #tpu.dot_dimension_numbers<[1], [0], [0], [1], [0, 0, 1, 1], [], []>} : vector<8x256xf32>, vector<256x64xf32>, vector<8x64xf32> -> vector<8x64xf32>
    %c0_3 = arith.constant 0 : index
    %c0_4 = arith.constant 0 : index
    %3 = vector.load %arg4[%c0_3, %c0_4] : memref<1x64xf32, #tpu.memory_space<vmem>>, vector<1x64xf32>
    %4 = vector.broadcast %3 : vector<1x64xf32> to vector<8x64xf32>
    %5 = arith.addf %2, %4 : vector<8x64xf32>
    %cst_5 = arith.constant 0.000000e+00 : f32
    %6 = vector.broadcast %cst_5 : f32 to vector<8x64xf32>
    %7 = arith.maximumf %5, %6 : vector<8x64xf32>
    %8 = math.absf %5 : vector<8x64xf32>
    %cst_6 = arith.constant 0.000000e+00 : f32
    %9 = vector.broadcast %cst_6 : f32 to vector<8x64xf32>
    %10 = arith.subf %9, %8 : vector<8x64xf32>
    %11 = math.exp %10 : vector<8x64xf32>
    %12 = math.log1p %11 : vector<8x64xf32>
    %13 = arith.addf %7, %12 : vector<8x64xf32>
    %c0_7 = arith.constant 0 : index
    %c0_8 = arith.constant 0 : index
    %14 = vector.load %arg5[%c0_7, %c0_8] : memref<64x32xf32, #tpu.memory_space<vmem>>, vector<64x32xf32>
    %cst_9 = arith.constant dense<0.000000e+00> : vector<8x32xf32>
    %15 = tpu.matmul %13, %14, %cst_9 {dimension_numbers = #tpu.dot_dimension_numbers<[1], [0], [0], [1], [0, 0, 1, 1], [], []>} : vector<8x64xf32>, vector<64x32xf32>, vector<8x32xf32> -> vector<8x32xf32>
    %c0_10 = arith.constant 0 : index
    %c0_11 = arith.constant 0 : index
    %16 = vector.load %arg6[%c0_10, %c0_11] : memref<1x32xf32, #tpu.memory_space<vmem>>, vector<1x32xf32>
    %17 = vector.broadcast %16 : vector<1x32xf32> to vector<8x32xf32>
    %18 = arith.addf %15, %17 : vector<8x32xf32>
    %c0_12 = arith.constant 0 : index
    %c0_13 = arith.constant 0 : index
    %19 = vector.load %arg7[%c0_12, %c0_13] : memref<64x32xf32, #tpu.memory_space<vmem>>, vector<64x32xf32>
    %cst_14 = arith.constant dense<0.000000e+00> : vector<8x32xf32>
    %20 = tpu.matmul %13, %19, %cst_14 {dimension_numbers = #tpu.dot_dimension_numbers<[1], [0], [0], [1], [0, 0, 1, 1], [], []>} : vector<8x64xf32>, vector<64x32xf32>, vector<8x32xf32> -> vector<8x32xf32>
    %c0_15 = arith.constant 0 : index
    %c0_16 = arith.constant 0 : index
    %21 = vector.load %arg8[%c0_15, %c0_16] : memref<1x32xf32, #tpu.memory_space<vmem>>, vector<1x32xf32>
    %22 = vector.broadcast %21 : vector<1x32xf32> to vector<8x32xf32>
    %23 = arith.addf %20, %22 : vector<8x32xf32>
    %24 = arith.mulf %18, %18 : vector<8x32xf32>
    %cst_17 = arith.constant 1.000000e+00 : f32
    %25 = vector.broadcast %cst_17 : f32 to vector<8x32xf32>
    %26 = arith.subf %25, %24 : vector<8x32xf32>
    %cst_18 = arith.constant 2.000000e+00 : f32
    %27 = vector.broadcast %cst_18 : f32 to vector<8x32xf32>
    %28 = arith.mulf %27, %23 : vector<8x32xf32>
    %29 = arith.addf %26, %28 : vector<8x32xf32>
    %cst_19 = arith.constant 2.000000e+00 : f32
    %30 = vector.broadcast %cst_19 : f32 to vector<8x32xf32>
    %31 = arith.mulf %30, %23 : vector<8x32xf32>
    %32 = math.exp %31 : vector<8x32xf32>
    %33 = arith.subf %29, %32 : vector<8x32xf32>
    %cst_20 = arith.constant dense<0.000000e+00> : vector<8xf32>
    %34 = vector.multi_reduction <add>, %33, %cst_20 [1] : vector<8x32xf32> to vector<8xf32>
    %35 = vector.shape_cast %34 : vector<8xf32> to vector<8x1xf32>
    %cst_21 = arith.constant -5.000000e-01 : f32
    %36 = vector.broadcast %cst_21 : f32 to vector<8x1xf32>
    %37 = arith.mulf %36, %35 : vector<8x1xf32>
    %c0_22 = arith.constant 0 : index
    %c0_23 = arith.constant 0 : index
    %38 = vector.load %arg9[%c0_22, %c0_23] : memref<34x256xf32, #tpu.memory_space<vmem>>, vector<34x256xf32>
    %cst_24 = arith.constant dense<0.000000e+00> : vector<8x34xf32>
    %39 = tpu.matmul %0, %38, %cst_24 {dimension_numbers = #tpu.dot_dimension_numbers<[1], [1], [0], [0], [0, 0, 1, 0], [], []>} : vector<8x256xf32>, vector<34x256xf32>, vector<8x34xf32> -> vector<8x34xf32>
    %40 = vector.extract_strided_slice %39 {offsets = [0, 0], sizes = [8, 32], strides = [1, 1]} : vector<8x34xf32> to vector<8x32xf32>
    %41 = vector.extract_strided_slice %39 {offsets = [0, 32], sizes = [8, 1], strides = [1, 1]} : vector<8x34xf32> to vector<8x1xf32>
    %42 = vector.extract_strided_slice %39 {offsets = [0, 33], sizes = [8, 1], strides = [1, 1]} : vector<8x34xf32> to vector<8x1xf32>
    %43 = math.exp %23 : vector<8x32xf32>
    %c0_25 = arith.constant 0 : index
    %c0_26 = arith.constant 0 : index
    %c0_27 = arith.constant 0 : index
    %44 = vector.load %arg2[%c0_25, %c0_26, %c0_27] : memref<2x8x32xf32, #tpu.memory_space<vmem>>, vector<2x8x32xf32>
    %45 = vector.shape_cast %43 : vector<8x32xf32> to vector<1x8x32xf32>
    %46 = vector.broadcast %45 : vector<1x8x32xf32> to vector<2x8x32xf32>
    %47 = arith.mulf %44, %46 : vector<2x8x32xf32>
    %48 = vector.shape_cast %18 : vector<8x32xf32> to vector<1x8x32xf32>
    %49 = vector.broadcast %48 : vector<1x8x32xf32> to vector<2x8x32xf32>
    %50 = arith.addf %47, %49 : vector<2x8x32xf32>
    %cst_28 = arith.constant dense<0xFF800000> : vector<2x8xf32>
    %51 = vector.multi_reduction <maximumf>, %50, %cst_28 [2] : vector<2x8x32xf32> to vector<2x8xf32>
    %52 = vector.shape_cast %51 : vector<2x8xf32> to vector<2x8x1xf32>
    %53 = vector.broadcast %52 : vector<2x8x1xf32> to vector<2x8x32xf32>
    %54 = arith.subf %50, %53 : vector<2x8x32xf32>
    %55 = math.exp %54 : vector<2x8x32xf32>
    %cst_29 = arith.constant dense<0.000000e+00> : vector<2x8xf32>
    %56 = vector.multi_reduction <add>, %55, %cst_29 [2] : vector<2x8x32xf32> to vector<2x8xf32>
    %57 = vector.shape_cast %56 : vector<2x8xf32> to vector<2x8x1xf32>
    %58 = tpu.reciprocal %57 {approx = true} : vector<2x8x1xf32> -> vector<2x8x1xf32>
    %59 = vector.broadcast %58 : vector<2x8x1xf32> to vector<2x8x32xf32>
    %60 = arith.mulf %55, %59 : vector<2x8x32xf32>
    %61 = vector.shape_cast %60 : vector<2x8x32xf32> to vector<16x32xf32>
    %62 = vector.extract_strided_slice %38 {offsets = [0, 0], sizes = [32, 256], strides = [1, 1]} : vector<34x256xf32> to vector<32x256xf32>
    %cst_30 = arith.constant dense<0.000000e+00> : vector<16x256xf32>
    %63 = tpu.matmul %61, %62, %cst_30 {dimension_numbers = #tpu.dot_dimension_numbers<[1], [0], [0], [1], [0, 0, 1, 1], [], []>} : vector<16x32xf32>, vector<32x256xf32>, vector<16x256xf32> -> vector<16x256xf32>
    %64 = vector.extract_strided_slice %38 {offsets = [32, 0], sizes = [1, 256], strides = [1, 1]} : vector<34x256xf32> to vector<1x256xf32>
    %65 = vector.broadcast %64 : vector<1x256xf32> to vector<16x256xf32>
    %66 = arith.addf %63, %65 : vector<16x256xf32>
    %cst_31 = arith.constant dense<0xFF800000> : vector<16xf32>
    %67 = vector.multi_reduction <maximumf>, %66, %cst_31 [1] : vector<16x256xf32> to vector<16xf32>
    %68 = vector.shape_cast %67 : vector<16xf32> to vector<16x1xf32>
    %69 = vector.broadcast %68 : vector<16x1xf32> to vector<16x256xf32>
    %70 = arith.subf %66, %69 : vector<16x256xf32>
    %71 = math.exp %70 : vector<16x256xf32>
    %cst_32 = arith.constant dense<0.000000e+00> : vector<16xf32>
    %72 = vector.multi_reduction <add>, %71, %cst_32 [1] : vector<16x256xf32> to vector<16xf32>
    %73 = vector.shape_cast %72 : vector<16xf32> to vector<16x1xf32>
    %74 = math.log %73 : vector<16x1xf32>
    %75 = arith.addf %68, %74 : vector<16x1xf32>
    %76 = vector.shape_cast %75 : vector<16x1xf32> to vector<2x8x1xf32>
    %cst_33 = arith.constant dense<0.000000e+00> : vector<8x1xf32>
    %77 = vector.multi_reduction <add>, %76, %cst_33 [0] : vector<2x8x1xf32> to vector<8x1xf32>
    %cst_34 = arith.constant dense<0.000000e+00> : vector<8x32xf32>
    %78 = vector.multi_reduction <add>, %60, %cst_34 [0] : vector<2x8x32xf32> to vector<8x32xf32>
    %79 = arith.mulf %78, %40 : vector<8x32xf32>
    %cst_35 = arith.constant dense<0.000000e+00> : vector<8xf32>
    %80 = vector.multi_reduction <add>, %79, %cst_35 [1] : vector<8x32xf32> to vector<8xf32>
    %81 = vector.shape_cast %80 : vector<8xf32> to vector<8x1xf32>
    %82 = arith.mulf %77, %42 : vector<8x1xf32>
    %83 = arith.subf %82, %81 : vector<8x1xf32>
    %cst_36 = arith.constant 5.000000e-01 : f32
    %84 = vector.broadcast %cst_36 : f32 to vector<8x1xf32>
    %85 = arith.mulf %83, %84 : vector<8x1xf32>
    %86 = arith.subf %85, %41 : vector<8x1xf32>
    %87 = tpu.concatenate %86, %37 in 1 : vector<8x1xf32>, vector<8x1xf32> -> vector<8x2xf32>
    %88 = tpu.transpose %87, [1, 0] : vector<8x2xf32> -> vector<2x8xf32>
    %c0_37 = arith.constant 0 : index
    %c0_38 = arith.constant 0 : index
    %89 = vector.load %arg10[%c0_37, %c0_38] : memref<2x8xf32, #tpu.memory_space<vmem>>, vector<2x8xf32>
    tpu.vector_store %arg10[%c0_37, %c0_38], %88 {strides = array<i32>} : memref<2x8xf32, #tpu.memory_space<vmem>>, vector<2x8xf32>,
    return
  }
  func.func @transform_0(%arg0: i32) -> (i32, i32) {
    %c0_i32 = arith.constant 0 : i32
    %c0_i32_0 = arith.constant 0 : i32
    return %arg0, %c0_i32 : i32, i32
  }
  func.func @transform_1(%arg0: i32) -> (i32, i32, i32) {
    %c0_i32 = arith.constant 0 : i32
    %c0_i32_0 = arith.constant 0 : i32
    %c0_i32_1 = arith.constant 0 : i32
    return %c0_i32, %arg0, %c0_i32_0 : i32, i32, i32
  }
  func.func @transform_2(%arg0: i32) -> (i32, i32) {
    %c0_i32 = arith.constant 0 : i32
    %c0_i32_0 = arith.constant 0 : i32
    %c0_i32_1 = arith.constant 0 : i32
    return %c0_i32, %c0_i32_0 : i32, i32
  }
  func.func @transform_3(%arg0: i32) -> (i32, i32) {
    %c0_i32 = arith.constant 0 : i32
    %c0_i32_0 = arith.constant 0 : i32
    %c0_i32_1 = arith.constant 0 : i32
    return %c0_i32, %c0_i32_0 : i32, i32
  }
  func.func @transform_4(%arg0: i32) -> (i32, i32) {
    %c0_i32 = arith.constant 0 : i32
    %c0_i32_0 = arith.constant 0 : i32
    %c0_i32_1 = arith.constant 0 : i32
    return %c0_i32, %c0_i32_0 : i32, i32
  }
  func.func @transform_5(%arg0: i32) -> (i32, i32) {
    %c0_i32 = arith.constant 0 : i32
    %c0_i32_0 = arith.constant 0 : i32
    %c0_i32_1 = arith.constant 0 : i32
    return %c0_i32, %c0_i32_0 : i32, i32
  }
  func.func @transform_6(%arg0: i32) -> (i32, i32) {
    %c0_i32 = arith.constant 0 : i32
    %c0_i32_0 = arith.constant 0 : i32
    %c0_i32_1 = arith.constant 0 : i32
    return %c0_i32, %c0_i32_0 : i32, i32
  }
  func.func @transform_7(%arg0: i32) -> (i32, i32) {
    %c0_i32 = arith.constant 0 : i32
    %c0_i32_0 = arith.constant 0 : i32
    %c0_i32_1 = arith.constant 0 : i32
    return %c0_i32, %c0_i32_0 : i32, i32
  }
  func.func @transform_8(%arg0: i32) -> (i32, i32) {
    %c0_i32 = arith.constant 0 : i32
    %c0_i32_0 = arith.constant 0 : i32
    %c0_i32_1 = arith.constant 0 : i32
    return %c0_i32, %c0_i32_0 : i32, i32
  }
  func.func @transform_9(%arg0: i32) -> (i32, i32) {
    %c0_i32 = arith.constant 0 : i32
    %c0_i32_0 = arith.constant 0 : i32
    return %c0_i32, %arg0 : i32, i32
  }
}

</mosaic_0001>

<bundles_post_ra>
// kernel: tpu_custom_call.1
= control target key start
LH: loop header
LB: loop body
LE: loop exit
PB: predicated region body
PF: predicated region fallthrough
CT: control target
= control target key end

     0   :  { %s1189_s0 = inlined_call_operand.vmem [shape: f32[8,256], index: 0, kind: input, shape index: {}]   ;;  %s1190_s1 = inlined_call_operand.vmem [shape: f32[2,8,32], index: 1, kind: input, shape index: {}]   ;;  %s1191_s2 = inlined_call_operand.vmem [shape: f32[256,64], index: 2, kind: input, shape index: {}]   ;;  %s1192_s3 = inlined_call_operand.vmem [shape: f32[1,64], index: 3, kind: input, shape index: {}]   ;;  %s1193_s4 = inlined_call_operand.vmem [shape: f32[64,32], index: 4, kind: input, shape index: {}]   ;;  %s1194_s5 = inlined_call_operand.vmem [shape: f32[1,32], index: 5, kind: input, shape index: {}]   ;;  %s1195_s6 = inlined_call_operand.vmem [shape: f32[64,32], index: 6, kind: input, shape index: {}]   ;;  %s1196_s7 = inlined_call_operand.vmem [shape: f32[1,32], index: 7, kind: input, shape index: {}]   ;;  %s1197_s8 = inlined_call_operand.vmem [shape: f32[34,256], index: 8, kind: input, shape index: {}]   ;;  %s1198_s9 = inlined_call_operand.hbm [shape: f32[2,8], index: 9, kind: output, shape index: {}]  }
   0x1   :  { %v51_v0 = vld [vmem:[%s1191_s2 + $0x80] sm:$0xff]  ;;  %v52_v1 = vld [vmem:[%s1191_s2 + $0x88] sm:$0xff]  ;;  %v53_v5 = vld [vmem:[%s1191_s2 + $0x90] sm:$0xff] }
   0x2   :  { %v35_v2 = vld [vmem:[%s1191_s2] sm:$0xff]  ;;  %v744_v3 = vpack.c.bf16 %v52_v1, %v51_v0  ;;  %v36_v4 = vld [vmem:[%s1191_s2 + $0x8] sm:$0xff]  ;;  %v54_v6 = vld [vmem:[%s1191_s2 + $0x98] sm:$0xff] }
   0x3   :  { %v746_v7 = vpack.c.bf16 %v36_v4, %v35_v2  ;;  %v748_v8 = vpack.c.bf16 %v54_v6, %v53_v5  ;;  %v37_v9 = vld [vmem:[%s1191_s2 + $0x10] sm:$0xff]  ;;  %v38_v10 = vld [vmem:[%s1191_s2 + $0x18] sm:$0xff]  ;;  %v55_v11 = vld [vmem:[%s1191_s2 + $0xa0] sm:$0xff] }
   0x4   :  { %745 = vmatprep.subr.bf16.mxu0 %v744_v3  ;;  %v56_v12 = vld [vmem:[%s1191_s2 + $0xa8] sm:$0xff]  ;;  %v750_v13 = vpack.c.bf16 %v38_v10, %v37_v9  ;;  %v39_v15 = vld [vmem:[%s1191_s2 + $0x20] sm:$0xff]  ;;  %v57_v17 = vld [vmem:[%s1191_s2 + $0xb0] sm:$0xff] }
   0x5   :  { %747 = vmatpush3.bf16.msra.mxu0 %v746_v7  ;;  %v752_v14 = vpack.c.bf16 %v56_v12, %v55_v11  ;;  %v40_v16 = vld [vmem:[%s1191_s2 + $0x28] sm:$0xff]  ;;  %v58_v18 = vld [vmem:[%s1191_s2 + $0xb8] sm:$0xff]  ;;  %v41_v21 = vld [vmem:[%s1191_s2 + $0x30] sm:$0xff] }
   0x6   :  { %749 = vmatprep.subr.bf16.mxu0 %v748_v8  ;;  %v754_v19 = vpack.c.bf16 %v40_v16, %v39_v15  ;;  %v756_v20 = vpack.c.bf16 %v58_v18, %v57_v17  ;;  %v42_v22 = vld [vmem:[%s1191_s2 + $0x38] sm:$0xff]  ;;  %v59_v23 = vld [vmem:[%s1191_s2 + $0xc0] sm:$0xff]  ;;  %v60_v24 = vld [vmem:[%s1191_s2 + $0xc8] sm:$0xff] }
   0x7   :  { %v34_v25 = vld [vmem:[%s1189_s0 + $0x8] sm:$0xff] }
   0x8   :  { %138 = vmatprep.mubr.f32.mxu0 %v34_v25 }
   0x9   :  { %751 = vmatpush3.bf16.msra.mxu0 %v750_v13 }
   0xa   :  { %753 = vmatprep.subr.bf16.mxu0 %v752_v14 }
   0xb   :  { %14 = vsyncpa [#allocation3], 0  ;;  %v758_v26 = vpack.c.bf16 %v42_v22, %v41_v21  ;;  %v760_v27 = vpack.c.bf16 %v60_v24, %v59_v23  ;;  %v43_v28 = vld [vmem:[%s1191_s2 + $0x40] sm:$0xff]  ;;  %v44_v29 = vld [vmem:[%s1191_s2 + $0x48] sm:$0xff]  ;;  %v874_v53 = vmov 0.0|0.0   ;;  %vm875_vm0 = vmmov 0  }
   0xc   :  { %v61_v30 = vld [vmem:[%s1191_s2 + $0xd0] sm:$0xff]  ;;  %v62_v31 = vld [vmem:[%s1191_s2 + $0xd8] sm:$0xff]  ;;  %v762_v32 = vpack.c.bf16 %v44_v29, %v43_v28  ;;  %v63_v36 = vld [vmem:[%s1191_s2 + $0xe0] sm:$0xff]  ;;  %776 = vmatprep.subr.bf16.mxu1 %v874_v53  ;;  %v876_v63 = vmov 0.0   ;;  %vm174_vm2 = vcmask 523264   ;;  %vm340_vm3 = vcmask 261120  }
   0xd   :  { %755 = vmatpush3.bf16.msra.mxu0 %v754_v19  ;;  %v764_v33 = vpack.c.bf16 %v62_v31, %v61_v30  ;;  %v45_v34 = vld [vmem:[%s1191_s2 + $0x50] sm:$0xff]  ;;  %v46_v35 = vld [vmem:[%s1191_s2 + $0x58] sm:$0xff]  ;;  %v64_v37 = vld [vmem:[%s1191_s2 + $0xe8] sm:$0xff]  ;;  %722 = vmatprep.mubr.msk.f32.mxu1 %vm875_vm0, %v876_v63  ;;  %vm596_vm4 = vcmask 7168   ;;  %s879_s21 = smov [#allocation2]   ;;  %vm630_vm5 = vcmask 58368  }
   0xe   :  { %757 = vmatprep.subr.bf16.mxu0 %v756_v20  ;;  %v766_v38 = vpack.c.bf16 %v46_v35, %v45_v34  ;;  %v768_v39 = vpack.c.bf16 %v64_v37, %v63_v36  ;;  %v47_v40 = vld [vmem:[%s1191_s2 + $0x60] sm:$0xff]  ;;  %v48_v41 = vld [vmem:[%s1191_s2 + $0x68] sm:$0xff]  ;;  %v65_v42 = vld [vmem:[%s1191_s2 + $0xf0] sm:$0xff]  ;;  %s638_s22 = sshll.u32 %s879_s21, 4  ;;  %s639_s22 = int_to_ptr.vmem [resolvable:$true] %s638_s22 }
   0xf   :  { %v66_v43 = vld [vmem:[%s1191_s2 + $0xf8] sm:$0xff]  ;;  %v770_v44 = vpack.c.bf16 %v48_v41, %v47_v40  ;;  %v49_v46 = vld [vmem:[%s1191_s2 + $0x70] sm:$0xff]  ;;  %v1032_v49 = vld [vmem:[%s1189_s0] sm:$0xff]  ;;  %s850_s23 = scalar_lea.vmem %s639_s22, 32  ;;  %p855_p1 = scmp.lt.s32.totalorder %s639_s22, %s639_s22 }
  0x10   :  { %v772_v45 = vpack.c.bf16 %v66_v43, %v65_v42  ;;  %v50_v47 = vld [vmem:[%s1191_s2 + $0x78] sm:$0xff]  ;;  %v159_v50 = vld [vmem:[%s1193_s4] sm:$0xff]  ;;  %v160_v51 = vld [vmem:[%s1193_s4 + $0x8] sm:$0xff]  ;;  %p851_p0 = scmp.ne.s32.totalorder %s639_s22, %s850_s23  ;;  %p856_p2 = scmp.lt.s32.totalorder %s850_s23, %s850_s23 }
  0x11   :  { %759 = vmatpush3.bf16.msra.mxu0 %v758_v26  ;;  %v774_v48 = vpack.c.bf16 %v50_v47, %v49_v46  ;;  %v777_v52 = vpack.c.bf16 %v160_v51, %v159_v50  ;;  %v161_v54 = vld [vmem:[%s1193_s4 + $0x10] sm:$0xff]  ;;  %v162_v55 = vld [vmem:[%s1193_s4 + $0x18] sm:$0xff]  ;;  %v163_v57 = vld [vmem:[%s1193_s4 + $0x20] sm:$0xff] }
  0x12   :  { %761 = vmatprep.subr.bf16.mxu0 %v760_v27  ;;  %v780_v56 = vpack.c.bf16 %v162_v55, %v161_v54  ;;  %v164_v58 = vld [vmem:[%s1193_s4 + $0x28] sm:$0xff]  ;;  %v165_v60 = vld [vmem:[%s1193_s4 + $0x30] sm:$0xff]  ;;  %v166_v61 = vld [vmem:[%s1193_s4 + $0x38] sm:$0xff]  ;;  %p857_p3 = por %p856_p2, %p855_p1 }
  0x13   :  { %778 = vmatpush3.bf16.msra.mxu1 %v777_v52  ;;  %v783_v59 = vpack.c.bf16 %v164_v58, %v163_v57  ;;  %v786_v62 = vpack.c.bf16 %v166_v61, %v165_v60  ;;  %v646_v1 = vld [vmem:[%s1192_s3] ss:$0 sm:$0xff]  ;;  %v249_v15 = vld [vmem:[%s1195_s6 + $0x8] sm:$0xff]  ;;  %v250_v22 = vld [vmem:[%s1195_s6 + $0x10] sm:$0xff] }
  0x14   :  { %779 = vmatprep.subr.bf16.mxu1 %v874_v53  ;;  %v248_v14 = vld [vmem:[%s1195_s6] sm:$0xff]  ;;  %v251_v23 = vld [vmem:[%s1195_s6 + $0x18] sm:$0xff]  ;;  %v253_v26 = vld [vmem:[%s1195_s6 + $0x28] sm:$0xff]  ;;  %p858_p4 = pnand %p857_p3, %p851_p0 }
  0x15   :  { %763 = vmatpush3.bf16.msra.mxu0 %v762_v32  ;;  %v789_v20 = vpack.c.bf16 %v249_v15, %v248_v14  ;;  %v792_v24 = vpack.c.bf16 %v251_v23, %v250_v22  ;;  %v254_v28 = vld [vmem:[%s1195_s6 + $0x30] sm:$0xff]  ;;  %v255_v29 = vld [vmem:[%s1195_s6 + $0x38] sm:$0xff]  ;;  %v346_v31 = vld [vmem:[%s1197_s8 + $0x8] sm:$0xff] }
  0x16   :  { %765 = vmatprep.subr.bf16.mxu0 %v764_v33  ;;  %v798_v30 = vpack.c.bf16 %v255_v29, %v254_v28  ;;  %v348_v32 = vld [vmem:[%s1197_s8 + $0x18] sm:$0xff]  ;;  %v345_v33 = vld [vmem:[%s1197_s8] sm:$0xff]  ;;  %v347_v35 = vld [vmem:[%s1197_s8 + $0x10] sm:$0xff]  ;;  %v455_v29 = vlaneseq }
  0x17   :  { %781 = vmatpush3.bf16.msra.mxu1 %v780_v56  ;;  %v800_v34 = vpack.c.bf16 %v348_v32, %v346_v31  ;;  %v350_v36 = vld [vmem:[%s1197_s8 + $0x28] sm:$0xff]  ;;  %v352_v37 = vld [vmem:[%s1197_s8 + $0x38] sm:$0xff]  ;;  %v349_v40 = vld [vmem:[%s1197_s8 + $0x20] sm:$0xff] }
  0x18   :  { %782 = vmatprep.subr.bf16.mxu1 %v874_v53  ;;  %v351_v41 = vld [vmem:[%s1197_s8 + $0x30] sm:$0xff]  ;;  %v1128_v43 = vld [vmem:[%s1197_s8 + $0x48] sm:$0x3]  ;;  %v647_v47 = vld [vmem:[%s1194_s5] ss:$0 sm:$0xff] }
  0x19   :  { %767 = vmatpush3.bf16.msra.mxu0 %v766_v38  ;;  %v802_v38 = vpack.c.bf16 %v347_v35, %v345_v33  ;;  %v806_v42 = vpack.c.bf16 %v351_v41, %v349_v40  ;;  %v649_v50 = vld [vmem:[%s1196_s7] ss:$0 sm:$0xff]  ;;  %v428_v60 = vld [vmem:[%s1190_s1 + $0x8] sm:$0xff]  ;;  %s878_s7 = smov 95  }
  0x1a   :  { %769 = vmatprep.subr.bf16.mxu0 %v768_v39  ;;  %v804_v39 = vpack.c.bf16 %v352_v37, %v350_v36 }
  0x1b   :  { %784 = vmatpush3.bf16.msra.mxu1 %v783_v59  ;;  %v427_v59 = vld [vmem:[%s1190_s1] sm:$0xff]  ;;  %s877_s1 = smov 1  }
  0x1c   :  { %785 = vmatprep.subr.bf16.mxu1 %v874_v53 }
  0x1d   :  { %771 = vmatpush3.bf16.msra.mxu0 %v770_v44  ;;  %v1134_v44 = vld [vmem:[%s1197_s8 + $0x40] sm:$0x3] }
  0x1e   :  { %773 = vmatprep.subr.bf16.mxu0 %v772_v45 }
  0x1f   :  { %787 = vmatpush3.bf16.msra.mxu1 %v786_v62 }
  0x20   :  { %788 = vmatprep.subr.bf16.mxu1 %v874_v53 }
  0x21   :  { %775 = vmatpush3.bf16.msra.mxu0 %v774_v48 }
  0x22   :  { %801 = vmatprep.subr.bf16.mxu0 %v800_v34 }
  0x24   :  { %139 = vmatmul.mubr.f32.vlgmr.msra.gmra.mrb[0].mxu0 %v1032_v49 }
  0x25   :  { %419 = vmatprep.mubr.f32.mxu0 %v34_v25  ;;  %v252_v25 = vld [vmem:[%s1195_s6 + $0x20] sm:$0xff] }
  0x26   :  { %v795_v27 = vpack.c.bf16 %v253_v26, %v252_v25 }
  0x2a   :  { %803 = vmatpush1.bf16.xpose.msra.mxu0 %v802_v38 }
  0x2b   :  { %805 = vmatprep.subr.bf16.mxu0 %v804_v39 }
  0x32   :  { %807 = vmatpush1.bf16.xpose.msra.mxu0 %v806_v42 }
  0x33   :  { %363 = vmatprep.subr.mxu0 %v1128_v43 }
  0x3a   :  { %364 = vmatpush1.xpose.msra.mxu0 %v1134_v44 }
  0x3d   :  { %420 = vmatmul.mubr.f32.vlgmr.msra.gmra.mrb[2].mxu0 %v1032_v49 }
  0xf7   :  { %v685_v0 = vpop.f32.mrb[0].mxu0 }
  0xf8   :  { %v686_v2 = vpop.f32.mrb[1].mxu0 }
  0xf9   :  { %v687_v3 = vadd.f32 %v686_v2, %v685_v0 }
  0xfb   :  { %v141_v4 = vadd.f32 %v687_v3, %v646_v1 }
  0xfd   :  { %v145_v5 = vand.u32 2147483647, %v141_v4  ;;  %v144_v18 = vmax.f32 %v141_v4, 0.0 }
  0xff   :  { %v146_v6 = vsub.f32 0.0, %v145_v5 }
 0x101   :  { %v147_v7 = vmul.f32 1.442695, %v146_v6 }
 0x103   :  { %822 = vpow2.f32 %v147_v7 }
 0x10d   :  { %v823_v8 = vpop.eup %822 }
 0x10e   :  { %v149_v9 = vadd.f32 1.0, %v823_v8  ;;  %v152_v10 = vmul.f32 -0.5, %v823_v8  ;;  %v155_v12 = vand.u32 2147483647, %v823_v8 }
 0x110   :  { %824 = vlog2.f32 %v149_v9  ;;  %v153_v11 = vadd.f32 1.0, %v152_v10  ;;  %vm156_vm1 = vcmp.lt.f32.partialorder %v155_v12, 0.0004427343 }
 0x112   :  { %v154_v17 = vmul.f32 %v823_v8, %v153_v11 }
 0x11a   :  { %v825_v13 = vpop.eup %824 }
 0x11b   :  { %v151_v16 = vmul.f32 0.6931472, %v825_v13 }
 0x11d   :  { %v157_v19 = vsel %vm156_vm1, %v154_v17, %v151_v16  ;;  %v1160_v17 = vpop.f32.mrb[2].mxu0 }
 0x11e   :  { %v158_v21 = vadd.f32 %v157_v19, %v144_v18  ;;  %v423_v18 = vpop.f32.mrb[3].mxu0 }
 0x120   :  { %723 = vmatmul.mubr.msk.f32.vlgmr.msra.gmra.mrb[0].mxu1 %vm174_vm2, %v158_v21 }
 0x121   :  { %790 = vmatpush3.bf16.msra.mxu1 %v789_v20  ;;  %741 = vmatprep.mubr.msk.f32.mxu1 %vm875_vm0, %v876_v63 }
 0x122   :  { %791 = vmatprep.subr.bf16.mxu1 %v874_v53 }
 0x125   :  { %793 = vmatpush3.bf16.msra.mxu1 %v792_v24 }
 0x126   :  { %794 = vmatprep.subr.bf16.mxu1 %v874_v53 }
 0x129   :  { %796 = vmatpush3.bf16.msra.mxu1 %v795_v27 }
 0x12a   :  { %797 = vmatprep.subr.bf16.mxu1 %v874_v53 }
 0x12d   :  { %799 = vmatpush3.bf16.msra.mxu1 %v798_v30  ;;  %v456_v30 = vshrl.u32 %v455_v29, 7 }
 0x12e   :  { %809 = vmatprep.subr.bf16.mxu1 %v800_v34 }
 0x12f   :  { %v457_v31 = vsub.s32 0, %v456_v30 }
 0x130   :  { %742 = vmatmul.mubr.msk.f32.vlgmr.msra.gmra.mrb[2].mxu1 %vm174_vm2, %v158_v21 }
 0x131   :  { %533 = vmatprep.mubr.f32.mxu1 %v876_v63  ;;  %811 = vmatpush1.bf16.msra.mxu1 %v802_v38  ;;  %v458_v32 = vrot.slane %v1134_v44, %v457_v31  ;;  %v462_v33 = vrot.slane %v1128_v43, %v457_v31 }
 0x132   :  { %813 = vmatprep.subr.bf16.mxu1 %v804_v39 }
 0x135   :  { %815 = vmatpush1.bf16.msra.mxu1 %v806_v42 }
 0x1f3   :  { %v244_v45 = vpop.f32.mrb[0].mxu1 }
 0x1f4   :  { %v724_v46 = vpop.f32.mrb[1].mxu1  ;;  %v245_v48 = vadd.f32 %v647_v47, %v244_v45 }
 0x1f6   :  { %v333_v51 = vmul.f32 %v245_v48, %v245_v48 }
 0x1f8   :  { %v334_v55 = vsub.f32 1.0, %v333_v51 }
 0x203   :  { %v329_v52 = vpop.f32.mrb[2].mxu1 }
 0x204   :  { %v330_v53 = vadd.f32 %v649_v50, %v329_v52  ;;  %v743_v54 = vpop.f32.mrb[3].mxu1 }
 0x206   :  { %v335_v56 = vmul.f32 2.0, %v330_v53  ;;  %v425_v57 = vmul.f32 1.442695, %v330_v53 }
 0x208   :  { %v337_v58 = vmul.f32 1.442695, %v335_v56  ;;  %826 = vpow2.f32 %v425_v57  ;;  %v1144_v49 = vadd.f32 %v335_v56, %v334_v55 }
 0x20a   :  { %828 = vpow2.f32 %v337_v58 }
 0x212   :  { %v827_v61 = vpop.eup %826 }
 0x213   :  { %v429_v62 = vmul.f32 %v827_v61, %v427_v59  ;;  %v430_v0 = vmul.f32 %v827_v61, %v428_v60 }
 0x214   :  { %v1152_v1 = vpop.eup %828 }
 0x215   :  { %v431_v2 = vadd.f32 %v429_v62, %v245_v48  ;;  %v432_v3 = vadd.f32 %v430_v0, %v245_v48  ;;  %v339_v4 = vsub.f32 %v1144_v49, %v1152_v1 }
 0x217   :  { %v433_v5 = vsel %vm340_vm3, %v431_v2, -inf  ;;  %v436_v6 = vsel %vm340_vm3, %v432_v3, -inf  ;;  %v341_v61 = vsel %vm340_vm3, %v339_v4, 0.0 }
 0x218   :  { %434 = vmax.xlane.f32.xlu0 %v433_v5 }
 0x21c   :  { %437 = vmax.xlane.f32.xlu0 %v436_v6 }
 0x2a5   :  { %v435_v7 = vpop.xlane.xlu0 %434 }
 0x2a6   :  { %v439_v8 = vsub.f32 %v431_v2, %v435_v7 }
 0x2a8   :  { %v441_v9 = vmul.f32 1.442695, %v439_v8 }
 0x2a9   :  { %v438_v10 = vpop.xlane.xlu0 %437 }
 0x2aa   :  { %830 = vpow2.f32 %v441_v9  ;;  %v440_v11 = vsub.f32 %v432_v3, %v438_v10 }
 0x2ac   :  { %v443_v12 = vmul.f32 1.442695, %v440_v11 }
 0x2ae   :  { %832 = vpow2.f32 %v443_v12 }
 0x2b4   :  { %v831_v13 = vpop.eup %830 }
 0x2b5   :  { %v445_v14 = vsel %vm340_vm3, %v831_v13, 0.0 }
 0x2b6   :  { %446 = vadd.xlane.f32.xlu1 %v445_v14 }
 0x2b8   :  { %v833_v15 = vpop.eup %832 }
 0x2b9   :  { %v448_v16 = vsel %vm340_vm3, %v833_v15, 0.0 }
 0x2ba   :  { %449 = vadd.xlane.f32.xlu1 %v448_v16 }
 0x343   :  { %v447_v19 = vpop.xlane.xlu1 %446 }
 0x344   :  { %834 = vrcp.f32 %v447_v19 }
 0x347   :  { %v450_v20 = vpop.xlane.xlu1 %449 }
 0x348   :  { %836 = vrcp.f32 %v450_v20 }
 0x34e   :  { %v835_v21 = vpop.eup %834 }
 0x34f   :  { %v453_v22 = vmul.f32 %v835_v21, %v831_v13 }
 0x351   :  { %651 = vmatmul.mubr.msk.f32.vlgmr.msra.gmra.mrb[4].mxu1 %vm340_vm3, %v453_v22  ;;  %v577_v25 = vsel %vm340_vm3, %v453_v22, 0.0 }
 0x352   :  { %v837_v23 = vpop.eup %836  ;;  %539 = vmatprep.mubr.f32.mxu1 %v876_v63 }
 0x353   :  { %v454_v24 = vmul.f32 %v837_v23, %v833_v15 }
 0x355   :  { %652 = vmatmul.mubr.msk.f32.gmra.mrb[6].mxu1 %vm340_vm3, %v454_v24  ;;  %v578_v26 = vsel %vm340_vm3, %v454_v24, 0.0 }
 0x356   :  { %v579_v27 = vadd.f32 %v578_v26, %v577_v25 }
 0x358   :  { %v580_v28 = vmul.f32 %v579_v27, %v1160_v17 }
 0x35a   :  { %v581_v60 = vsel %vm340_vm3, %v580_v28, 0.0 }
 0x424   :  { %v535_v34 = vpop.f32.mrb[4].mxu1 }
 0x425   :  { %v536_v35 = vadd.f32 %v535_v34, %v458_v32  ;;  %v537_v63 = vpop.f32.mrb[5].mxu1 }
 0x426   :  { %v538_v36 = vadd.f32 %v537_v63, %v462_v33 }
 0x428   :  { %v541_v37 = vpop.f32.mrb[6].mxu1  ;;  %v546_v38 = vmax.f32 %v536_v35, %v538_v36 }
 0x429   :  { %v542_v39 = vadd.f32 %v541_v37, %v458_v32  ;;  %v543_v40 = vpop.f32.mrb[7].mxu1 }
 0x42a   :  { %v544_v41 = vadd.f32 %v543_v40, %v462_v33  ;;  %547 = vmax.xlane.f32.xlu0 %v546_v38 }
 0x42c   :  { %v549_v42 = vmax.f32 %v542_v39, %v544_v41 }
 0x42e   :  { %550 = vmax.xlane.f32.xlu1 %v549_v42 }
 0x4b7   :  { %v548_v45 = vpop.xlane.xlu0 %547 }
 0x4b8   :  { %v552_v46 = vsub.f32 %v536_v35, %v548_v45  ;;  %v553_v47 = vsub.f32 %v538_v36, %v548_v45 }
 0x4ba   :  { %v556_v48 = vmul.f32 1.442695, %v552_v46  ;;  %v558_v50 = vmul.f32 1.442695, %v553_v47 }
 0x4bb   :  { %v551_v44 = vpop.xlane.xlu1 %550 }
 0x4bc   :  { %838 = vpow2.f32 %v556_v48  ;;  %v554_v43 = vsub.f32 %v542_v39, %v551_v44  ;;  %v555_v51 = vsub.f32 %v544_v41, %v551_v44 }
 0x4bd   :  { %840 = vpow2.f32 %v558_v50 }
 0x4be   :  { %v560_v52 = vmul.f32 1.442695, %v554_v43  ;;  %v562_v53 = vmul.f32 1.442695, %v555_v51 }
 0x4c0   :  { %842 = vpow2.f32 %v560_v52 }
 0x4c1   :  { %844 = vpow2.f32 %v562_v53 }
 0x4c6   :  { %v839_v54 = vpop.eup %838 }
 0x4c7   :  { %v841_v55 = vpop.eup %840 }
 0x4c8   :  { %v564_v56 = vadd.f32 %v841_v55, %v839_v54 }
 0x4ca   :  { %v843_v57 = vpop.eup %842  ;;  %565 = vadd.xlane.f32.xlu0 %v564_v56 }
 0x4cb   :  { %v845_v58 = vpop.eup %844 }
 0x4cc   :  { %v567_v59 = vadd.f32 %v845_v58, %v843_v57 }
 0x4ce   :  { %568 = vadd.xlane.f32.xlu1 %v567_v59  ;;  %582 = vadd.xlane.f32.xlu0 %v581_v60 }
 0x4d2   :  { %342 = vadd.xlane.f32.xlu0 %v341_v61 }
 0x4df   :  { %588 = vrot.lane.b32.xlu1 %v1160_v17, %s877_s1 }
 0x557   :  { %v566_v62 = vpop.xlane.xlu0 %565 }
 0x558   :  { %846 = vlog2.f32 %v566_v62 }
 0x55b   :  { %v569_v0 = vpop.xlane.xlu1 %568  ;;  %v583_v49 = vpop.xlane.xlu0 %582 }
 0x55c   :  { %848 = vlog2.f32 %v569_v0 }
 0x55f   :  { %v589_v11 = vpop.permute.xlu1 %588  ;;  %v343_v13 = vpop.xlane.xlu0 %342 }
 0x560   :  { %v344_v14 = vmul.f32 -0.5, %v343_v13 }
 0x562   :  { %v847_v2 = vpop.eup %846 }
 0x563   :  { %v571_v3 = vmul.f32 0.6931472, %v847_v2 }
 0x565   :  { %v574_v7 = vadd.f32 %v571_v3, %v548_v45 }
 0x566   :  { %v849_v5 = vpop.eup %848 }
 0x567   :  { %v573_v6 = vmul.f32 0.6931472, %v849_v5 }
 0x569   :  { %v575_v8 = vadd.f32 %v573_v6, %v551_v44 }
 0x56b   :  { %v576_v9 = vadd.f32 %v575_v8, %v574_v7 }
 0x56d   :  { %v584_v10 = vmul.f32 %v576_v9, %v1160_v17 }
 0x56f   :  { %v585_v1 = vsub.f32 %v584_v10, %v583_v49 }
 0x571   :  { %v586_v4 = vmul.f32 0.5, %v585_v1 }
 0x573   :  { %v591_v12 = vsub.f32 %v586_v4, %v589_v11 }
 0x575   :  { %593 = vrot.lane.b32.xlu0 %v591_v12, %s878_s7 }
 0x5e7   :  { %v594_v15 = vpop.permute.xlu0 %593 }
 0x5e8   :  { %v597_v16 = vsel %vm596_vm4, %v594_v15, %v344_v14 }
 0x5e9   :  { %598 = vxpose.xlu1.b32.start.end [1/1] (short) (narrow) %v597_v16, 8 }
 0x669   :  { %v614_v18 = vpop.trf.xlu1 }
 0x66a   :  { %631 = vst.msk [vmem:[#allocation2] sm:$0x3] %vm630_vm5, %v614_v18 }
 0x66b   :  { %861 = shalt.err (!%p858_p4)
}
 0x66c   :  { %s862_s26 = scalar_lea.hbm %s1198_s9, 32 }
 0x66d   :  { %p863_p5 = scmp.ne.s32.totalorder %s1198_s9, %s862_s26  ;;  %p866_p6 = scmp.lt.u32.totalorder %s862_s26, %s1198_s9 }
 0x66f   :  { %p868_p7 = pnand %p866_p6, %p863_p5 }
 0x671   :  { %871 = shalt.err (!%p868_p7)
}
 0x672   :  { %641 = dma.vmem_to_hbm [thread:$0]  %s639_s22, 32, %s1198_s9, [#allocation3]  }
 0x673   :  { %872 = dma.done.wait [#allocation3], 32  }
 0x674   :  { %873 = vsyncadd [#allocation3], 4294967264 }
 0x675   :  { %645 = vsyncpa [#allocation3], 1 }

</bundles_post_ra>
